<compile_context>
chip_gen: v7x
topology: tpu7x:2x2x1
jax: 0.10.0
libtpu: 0.0.40
codegen_flags: <defaults>
</compile_context>

<pallas_src>
import jax
import jax.numpy as jnp
from jax import lax
from jax.experimental import pallas as pl
from jax.experimental.pallas import tpu as pltpu


def _attention_kernel(x_ref, xq_ref, wq_ref, wkv_t_ref, wo_t_ref, o_ref):
    # x_ref:   (1, C, S)   full token axis (for K/V), channels-major
    # xq_ref:  (1, C, tq)  this q-tile's tokens
    # wq_ref:  (C, C)      Wq * 1/sqrt(C), bf16
    # wkv_t_ref: (2C, C)   [Wk | Wv]^T, bf16
    # wo_t_ref:  (C, C)    Wo^T, bf16
    # o_ref:   (1, C, tq)
    C = wo_t_ref.shape[0]

    x_bf = x_ref[0].astype(jnp.bfloat16)          # (C, S)  lane-dense
    xq_bf = xq_ref[0].astype(jnp.bfloat16)        # (C, tq)

    # K, V over the whole token axis, channels-major: (2C, S), f32 acc.
    kv_t = jnp.dot(wkv_t_ref[...], x_bf, preferred_element_type=jnp.float32)
    k_t = kv_t[:C, :].astype(jnp.bfloat16)        # (C, S)
    v_t = kv_t[C:, :].astype(jnp.bfloat16)        # (C, S)

    # Q for this tile only, token-major; 1/sqrt(C) already folded into wq_ref.
    #   q_s[i, c'] = sum_c xq[c, i] * wq[c, c']   -> (tq, C)
    q_s = lax.dot_general(xq_bf, wq_ref[...], (((0,), (0,)), ((), ())),
                          preferred_element_type=jnp.float32)
    q_s = q_s.astype(jnp.bfloat16)                # (tq, C)

    # scores = q_s @ k_t : (tq, C) x (C, S) -> (tq, S), MXU-native MKN form.
    scores = jnp.dot(q_s, k_t, preferred_element_type=jnp.float32)

    # Softmax over tokens (f32 math; works on v5e which has no bf16 VPU/EUP).
    scores = scores - jnp.max(scores, axis=-1, keepdims=True)
    p = jnp.exp(scores)
    p = p * pl.reciprocal(jnp.sum(p, axis=-1, keepdims=True), approx=True)
    p_bf = p.astype(jnp.bfloat16)                 # (tq, S)

    # out_t[c, i] = sum_j v_t[c, j] * p[i, j]  -> (C, tq)  (transposed-RHS form)
    out_t = lax.dot_general(v_t, p_bf, (((1,), (1,)), ((), ())),
                            preferred_element_type=jnp.float32)

    # final = Wo^T @ out_t -> (C, tq), already in output layout.
    final_t = jnp.dot(wo_t_ref[...], out_t.astype(jnp.bfloat16),
                      preferred_element_type=jnp.float32)

    o_ref[0] = final_t.astype(o_ref.dtype)        # lane-dense store


def attention_tokens_nchw(x_flat, wq, wk, wv, wo, tq=128):
    """Self-attention over the token axis of x_flat: (B, C, S) -> (B, C, S)."""
    B, C, S = x_flat.shape
    scale = 1.0 / (C ** 0.5)

    # Q-tile size must keep the lane dim a multiple of 128 (or be full S).
    if S % tq != 0 or tq % 128 != 0:
        tq = S
    nq = S // tq

    # Pre-cast weights to bf16 (MXU-native), fold the attention scale into Wq,
    # and pre-transpose K/V/O weights so every in-kernel matmul is MXU-native
    # in (channels, tokens) layout.  All tiny, outside the hot path.
    wq_s = (wq * scale).astype(jnp.bfloat16)                       # (C, C)
    wkv_t = jnp.concatenate([wk, wv], axis=1).T.astype(jnp.bfloat16)  # (2C, C)
    wo_t = wo.T.astype(jnp.bfloat16)                               # (C, C)

    return pl.pallas_call(
        _attention_kernel,
        out_shape=jax.ShapeDtypeStruct((B, C, S), x_flat.dtype),
        grid_spec=pltpu.PrefetchScalarGridSpec(
            num_scalar_prefetch=0,
            grid=(B, nq),
            in_specs=[
                pl.BlockSpec((1, C, S), lambda b, q: (b, 0, 0)),    # x (K/V)
                pl.BlockSpec((1, C, tq), lambda b, q: (b, 0, q)),   # x q-tile
                pl.BlockSpec((C, C), lambda b, q: (0, 0)),          # Wq*scale
                pl.BlockSpec((2 * C, C), lambda b, q: (0, 0)),      # [Wk|Wv]^T
                pl.BlockSpec((C, C), lambda b, q: (0, 0)),          # Wo^T
            ],
            out_specs=pl.BlockSpec((1, C, tq), lambda b, q: (b, 0, q)),
        ),
        compiler_params=pltpu.CompilerParams(
            dimension_semantics=("parallel", "parallel"),
            vmem_limit_bytes=48 * 1024 * 1024,   # headroom under v7x's 64 MiB
        ),
    )(x_flat, x_flat, wq_s, wkv_t, wo_t)


def einops_to_and_from(x, wq, wk, wv, wo):
    """EinopsToAndFrom('b c h w', 'b (h w) c', attention) forward pass.

    x: (B, C, H, W)  ->  returns (B, C, H, W)
    """
    B, C, H, W = x.shape
    # 'b c h w -> b c (h w)' is a contiguous reshape (no HBM traffic); the
    # tokens-major rearrange is folded into the kernel's (C, tokens) layout,
    # so there is no out-of-kernel transpose in either direction.
    tokens = x.reshape(B, C, H * W)
    out = attention_tokens_nchw(tokens, wq, wk, wv, wo)
    return out.reshape(B, C, H, W)


def _reference(x, wq, wk, wv, wo):
    B, C, H, W = x.shape
    t = jnp.transpose(x, (0, 2, 3, 1)).reshape(B, H * W, C).astype(jnp.float32)
    q = t @ wq
    k = t @ wk
    v = t @ wv
    s = jnp.einsum("bqc,bkc->bqk", q, k) / (C ** 0.5)
    p = jax.nn.softmax(s, axis=-1)
    o = jnp.einsum("bqk,bkc->bqc", p, v) @ wo
    return o.reshape(B, H, W, C).transpose(0, 3, 1, 2).astype(x.dtype)


if __name__ == "__main__":
    # Small but lane-friendly shapes: seq = H*W = 256 tokens (2 q-tiles of 128).
    B, C, H, W = 2, 32, 16, 16

    key = jax.random.PRNGKey(0)
    kx, kq, kk, kv, ko = jax.random.split(key, 5)

    x = jax.random.normal(kx, (B, C, H, W), dtype=jnp.float32)
    # Deterministic synthetic attention weights (shapes implied by fn: C -> C).
    wq = jax.random.normal(kq, (C, C), dtype=jnp.float32) * 0.1
    wk = jax.random.normal(kk, (C, C), dtype=jnp.float32) * 0.1
    wv = jax.random.normal(kv, (C, C), dtype=jnp.float32) * 0.1
    wo = jax.random.normal(ko, (C, C), dtype=jnp.float32) * 0.1

    out = einops_to_and_from(x, wq, wk, wv, wo)
    out = jax.block_until_ready(out)

    ref = _reference(x, wq, wk, wv, wo)
    assert out.shape == x.shape, (out.shape, x.shape)
    # Tolerance accounts for bf16 MXU operands everywhere plus the approx
    # reciprocal in the softmax denominator (per perf review).
    assert jnp.allclose(out, ref, atol=3e-2, rtol=3e-2), "mismatch vs reference"

    print("KERNEL_OK")
</pallas_src>

<mosaic_0001>
module attributes {stable_mosaic.version = 11 : i64} {
  func.func @_attention_kernel(%arg0: i32, %arg1: i32, %arg2: memref<1x32x256xf32, #tpu.memory_space<vmem>>, %arg3: memref<1x32x128xf32, #tpu.memory_space<vmem>>, %arg4: memref<32x32xbf16, #tpu.memory_space<vmem>>, %arg5: memref<64x32xbf16, #tpu.memory_space<vmem>>, %arg6: memref<32x32xbf16, #tpu.memory_space<vmem>>, %arg7: memref<1x32x128xf32, #tpu.memory_space<vmem>>) attributes {dimension_semantics = [#tpu.dimension_semantics<parallel>, #tpu.dimension_semantics<parallel>], iteration_bounds = array<i64: 2, 2>, scalar_prefetch = 0 : i64, scratch_operands = 0 : i64, tpu.core_type = #tpu.core_type<tc>, window_params = [{transform_indices = @transform_0, window_bounds = array<i64: 1, 32, 256>}, {transform_indices = @transform_1, window_bounds = array<i64: 1, 32, 128>}, {pipeline_mode = #tpu.pipeline_mode<synchronous>, transform_indices = @transform_2, window_bounds = array<i64: 32, 32>}, {pipeline_mode = #tpu.pipeline_mode<synchronous>, transform_indices = @transform_3, window_bounds = array<i64: 64, 32>}, {pipeline_mode = #tpu.pipeline_mode<synchronous>, transform_indices = @transform_4, window_bounds = array<i64: 32, 32>}, {transform_indices = @transform_5, window_bounds = array<i64: 1, 32, 128>}]} {
    %c0 = arith.constant 0 : index
    %c0_0 = arith.constant 0 : index
    %c0_1 = arith.constant 0 : index
    %0 = vector.load %arg2[%c0, %c0_0, %c0_1] : memref<1x32x256xf32, #tpu.memory_space<vmem>>, vector<1x32x256xf32>
    %1 = vector.shape_cast %0 : vector<1x32x256xf32> to vector<32x256xf32>
    %2 = arith.truncf %1 : vector<32x256xf32> to vector<32x256xbf16>
    %c0_2 = arith.constant 0 : index
    %c0_3 = arith.constant 0 : index
    %c0_4 = arith.constant 0 : index
    %3 = vector.load %arg3[%c0_2, %c0_3, %c0_4] : memref<1x32x128xf32, #tpu.memory_space<vmem>>, vector<1x32x128xf32>
    %4 = vector.shape_cast %3 : vector<1x32x128xf32> to vector<32x128xf32>
    %5 = arith.truncf %4 : vector<32x128xf32> to vector<32x128xbf16>
    %c0_5 = arith.constant 0 : index
    %c0_6 = arith.constant 0 : index
    %6 = vector.load %arg5[%c0_5, %c0_6] : memref<64x32xbf16, #tpu.memory_space<vmem>>, vector<64x32xbf16>
    %cst = arith.constant dense<0.000000e+00> : vector<64x256xf32>
    %7 = tpu.matmul %6, %2, %cst {dimension_numbers = #tpu.dot_dimension_numbers<[1], [0], [0], [1], [0, 0, 1, 1], [], []>} : vector<64x32xbf16>, vector<32x256xbf16>, vector<64x256xf32> -> vector<64x256xf32>
    %8 = vector.extract_strided_slice %7 {offsets = [0, 0], sizes = [32, 256], strides = [1, 1]} : vector<64x256xf32> to vector<32x256xf32>
    %9 = arith.truncf %8 : vector<32x256xf32> to vector<32x256xbf16>
    %10 = vector.extract_strided_slice %7 {offsets = [32, 0], sizes = [32, 256], strides = [1, 1]} : vector<64x256xf32> to vector<32x256xf32>
    %11 = arith.truncf %10 : vector<32x256xf32> to vector<32x256xbf16>
    %c0_7 = arith.constant 0 : index
    %c0_8 = arith.constant 0 : index
    %12 = vector.load %arg4[%c0_7, %c0_8] : memref<32x32xbf16, #tpu.memory_space<vmem>>, vector<32x32xbf16>
    %cst_9 = arith.constant dense<0.000000e+00> : vector<128x32xf32>
    %13 = tpu.matmul %5, %12, %cst_9 {dimension_numbers = #tpu.dot_dimension_numbers<[0], [0], [1], [1], [0, 1, 1, 1], [], []>} : vector<32x128xbf16>, vector<32x32xbf16>, vector<128x32xf32> -> vector<128x32xf32>
    %14 = arith.truncf %13 : vector<128x32xf32> to vector<128x32xbf16>
    %cst_10 = arith.constant dense<0.000000e+00> : vector<128x256xf32>
    %15 = tpu.matmul %14, %9, %cst_10 {dimension_numbers = #tpu.dot_dimension_numbers<[1], [0], [0], [1], [0, 0, 1, 1], [], []>} : vector<128x32xbf16>, vector<32x256xbf16>, vector<128x256xf32> -> vector<128x256xf32>
    %cst_11 = arith.constant dense<0xFF800000> : vector<128xf32>
    %16 = vector.multi_reduction <maximumf>, %15, %cst_11 [1] : vector<128x256xf32> to vector<128xf32>
    %17 = vector.shape_cast %16 : vector<128xf32> to vector<128x1xf32>
    %18 = vector.broadcast %17 : vector<128x1xf32> to vector<128x256xf32>
    %19 = arith.subf %15, %18 : vector<128x256xf32>
    %20 = math.exp %19 : vector<128x256xf32>
    %cst_12 = arith.constant dense<0.000000e+00> : vector<128xf32>
    %21 = vector.multi_reduction <add>, %20, %cst_12 [1] : vector<128x256xf32> to vector<128xf32>
    %22 = vector.shape_cast %21 : vector<128xf32> to vector<128x1xf32>
    %23 = tpu.reciprocal %22 {approx = true} : vector<128x1xf32> -> vector<128x1xf32>
    %24 = vector.broadcast %23 : vector<128x1xf32> to vector<128x256xf32>
    %25 = arith.mulf %20, %24 : vector<128x256xf32>
    %26 = arith.truncf %25 : vector<128x256xf32> to vector<128x256xbf16>
    %cst_13 = arith.constant dense<0.000000e+00> : vector<32x128xf32>
    %27 = tpu.matmul %11, %26, %cst_13 {dimension_numbers = #tpu.dot_dimension_numbers<[1], [1], [0], [0], [0, 0, 1, 0], [], []>} : vector<32x256xbf16>, vector<128x256xbf16>, vector<32x128xf32> -> vector<32x128xf32>
    %c0_14 = arith.constant 0 : index
    %c0_15 = arith.constant 0 : index
    %28 = vector.load %arg6[%c0_14, %c0_15] : memref<32x32xbf16, #tpu.memory_space<vmem>>, vector<32x32xbf16>
    %29 = arith.truncf %27 : vector<32x128xf32> to vector<32x128xbf16>
    %cst_16 = arith.constant dense<0.000000e+00> : vector<32x128xf32>
    %30 = tpu.matmul %28, %29, %cst_16 {dimension_numbers = #tpu.dot_dimension_numbers<[1], [0], [0], [1], [0, 0, 1, 1], [], []>} : vector<32x32xbf16>, vector<32x128xbf16>, vector<32x128xf32> -> vector<32x128xf32>
    %c0_17 = arith.constant 0 : index
    %c0_18 = arith.constant 0 : index
    %c0_19 = arith.constant 0 : index
    %31 = vector.load %arg7[%c0_17, %c0_18, %c0_19] : memref<1x32x128xf32, #tpu.memory_space<vmem>>, vector<1x32x128xf32>
    %32 = vector.shape_cast %31 : vector<1x32x128xf32> to vector<32x128xf32>
    %33 = vector.shape_cast %30 : vector<32x128xf32> to vector<1x32x128xf32>
    tpu.vector_store %arg7[%c0_17, %c0_18, %c0_19], %33 {strides = array<i32>} : memref<1x32x128xf32, #tpu.memory_space<vmem>>, vector<1x32x128xf32>,
    return
  }
  func.func @transform_0(%arg0: i32, %arg1: i32) -> (i32, i32, i32) {
    %c0_i32 = arith.constant 0 : i32
    %c0_i32_0 = arith.constant 0 : i32
    %c0_i32_1 = arith.constant 0 : i32
    return %arg0, %c0_i32, %c0_i32_0 : i32, i32, i32
  }
  func.func @transform_1(%arg0: i32, %arg1: i32) -> (i32, i32, i32) {
    %c0_i32 = arith.constant 0 : i32
    %c0_i32_0 = arith.constant 0 : i32
    return %arg0, %c0_i32, %arg1 : i32, i32, i32
  }
  func.func @transform_2(%arg0: i32, %arg1: i32) -> (i32, i32) {
    %c0_i32 = arith.constant 0 : i32
    %c0_i32_0 = arith.constant 0 : i32
    %c0_i32_1 = arith.constant 0 : i32
    return %c0_i32, %c0_i32_0 : i32, i32
  }
  func.func @transform_3(%arg0: i32, %arg1: i32) -> (i32, i32) {
    %c0_i32 = arith.constant 0 : i32
    %c0_i32_0 = arith.constant 0 : i32
    %c0_i32_1 = arith.constant 0 : i32
    return %c0_i32, %c0_i32_0 : i32, i32
  }
  func.func @transform_4(%arg0: i32, %arg1: i32) -> (i32, i32) {
    %c0_i32 = arith.constant 0 : i32
    %c0_i32_0 = arith.constant 0 : i32
    %c0_i32_1 = arith.constant 0 : i32
    return %c0_i32, %c0_i32_0 : i32, i32
  }
  func.func @transform_5(%arg0: i32, %arg1: i32) -> (i32, i32, i32) {
    %c0_i32 = arith.constant 0 : i32
    %c0_i32_0 = arith.constant 0 : i32
    return %arg0, %c0_i32, %arg1 : i32, i32, i32
  }
}

</mosaic_0001>

<bundles_post_ra>
// kernel: tpu_custom_call.1
= control target key start
LH: loop header
LB: loop body
LE: loop exit
PB: predicated region body
PF: predicated region fallthrough
CT: control target
= control target key end

     0   :  { %s2439_s0 = inlined_call_operand.hbm [shape: f32[2,32,256], index: 0, kind: input, shape index: {}]   ;;  %s2440_s1 = inlined_call_operand.hbm [shape: f32[2,32,256], index: 1, kind: input, shape index: {}]   ;;  %s2441_s2 = inlined_call_operand.vmem [shape: bf16[32,32], index: 2, kind: input, shape index: {}]   ;;  %s2442_s3 = inlined_call_operand.vmem [shape: bf16[64,32], index: 3, kind: input, shape index: {}]   ;;  %s2443_s4 = inlined_call_operand.vmem [shape: bf16[32,32], index: 4, kind: input, shape index: {}]   ;;  %s2444_s5 = inlined_call_operand.hbm [shape: f32[2,32,256], index: 5, kind: output, shape index: {}]  }
   0x1   :  { %2459 = sst [smem:[#allocation17_spill]] %s2439_s0 }
   0x2   :  { %2460 = sst [smem:[#allocation18_spill]] %s2441_s2 }
   0x3   :  { %2461 = sst [smem:[#allocation19_spill]] %s2443_s4 }
   0x4   :  { %2462 = sst [smem:[#allocation20_spill]] %s2444_s5 }
   0x5   :  { %10 = vsyncpa [#allocation3], 0 }
   0x6   :  { %12 = vsyncpa [#allocation3 + $0x1], 0 }
   0x7   :  { %13 = vsyncpa [#allocation6], 0 }
   0x8   :  { %15 = vsyncpa [#allocation6 + $0x1], 0 }
   0x9   :  { %16 = vsyncpa [#allocation4], 0 }
   0xa   :  { %18 = vsyncpa [#allocation4 + $0x1], 0  ;;  %s1785_s18 = smov 0   ;;  %s1787_s19 = smov 0  }
   0xb   :  { %s1789_s20 = smov 0   ;;  %s1791_s21 = smov 0  }
   0xc   :  { %s1793_s22 = smov 0   ;;  %s1795_s23 = smov 0  }
   0xd   :  { %s1797_s24 = smov 0   ;;  %s1799_s25 = smov 0  }
   0xe   :  { %s1801_s26 = smov 0   ;;  %s1803_s27 = smov 0  }
   0xf   :  { %s1805_s28 = smov 0  }
  0x10 LB: > { %2463 = sst [smem:[#allocation11_spill]] %s1702_s18  ;;  %s1245_s29 = sadd.s32 4294967295, %s1742_s28   ;;  %s1742_s28 = sphi %s1805_s28, %s24_s28   ;;  %s1738_s27 = sphi %s1803_s27, %s2507_s27   ;;  %s1734_s26 = sphi %s1801_s26, %s2506_s26   ;;  %s1730_s25 = sphi %s1799_s25, %s2505_s25   ;;  %s1726_s24 = sphi %s1797_s24, %s2504_s24   ;;  %s1722_s23 = sphi %s1795_s23, %s2503_s23   ;;  %s1718_s22 = sphi %s1793_s22, %s2502_s22   ;;  %s1714_s21 = sphi %s1791_s21, %s2501_s21   ;;  %s1710_s20 = sphi %s1789_s20, %s2500_s20   ;;  %s1706_s19 = sphi %s1787_s19, %s2499_s19   ;;  %s1702_s18 = sphi %s1785_s18, %s2498_s18  }
  0x11   : > { %2464 = sst [smem:[#allocation12_spill]] %s1726_s24  ;;  %s36_s30 = sadd.s32 1, %s1738_s27 }
  0x12   : > { %2465 = sst [smem:[#allocation13_spill]] %s1730_s25  ;;  %p50_p0 = scmp.ne.s32.totalorder %s1722_s23, %s1718_s22 }
  0x13   : > { %p2446_p1 = scmp.eq.s32.totalorder %s1742_s28, 0  ;;  %p56_p2 = scmp.ne.s32.totalorder %s1718_s22, %s1714_s21 }
  0x14   : > { %p1847_p3 = scmp.eq.s32.totalorder %s1245_s29, 0  ;;  %p2445_p5 = scmp.lt.s32.totalorder %s1742_s28, 4 }
  0x15   : > { %p52_p4 = por %p2446_p1, %p50_p0  ;;  %s208_s9 = sand.u32 1, %s1722_s23  }
  0x16   : > { %p1856_p6 = por %p1847_p3, %p56_p2  ;;  %s1249_s10 = sshll.u32 %s208_s9, 6 }
  0x17   : > { %s1294_s11 = sshll.u32 %s1738_s27, 10  ;;  %s2468_s0 = sld [smem:[#allocation17_spill]] }
  0x18   : > { %s2467_s8 = scalar_select %p1856_p6, 1, 0 }
  0x19   : > { %s212_s15 = scalar_lea.vmem [#allocation2], %s1249_s10  ;;  %p1871_p7 = pnand %p2445_p5, %p52_p4 }
  0x1a   : > { %s219_s16 = sshll.u32 %s212_s15, 4  ;;  %s1876_s21 = scalar_lea.sflag [#allocation3], %s208_s9  ;;  %s1867_s16 = int_to_ptr.vmem [resolvable:$true] %s219_s16 }
  0x1b   : > { %p1558_p10 = pneg %p1871_p7 }
  0x1d   : > { %s1865_s14 = scalar_lea.hbm %s2468_s0, %s1294_s11  ;;  %s1561_s13 = scalar_lea.hbm %s2468_s0, 2048 }
  0x1e   : > { %s1556_s11 = scalar_lea.hbm %s1865_s14, 1024  ;;  %p1562_p13 = scmp.lt.u32.totalorder %s1865_s14, %s2468_s0 }
  0x1f   : > { %p1557_p9 = scmp.ne.s32.totalorder %s1865_s14, %s1556_s11  ;;  %p1563_p0 = scmp.lt.u32.totalorder %s1561_s13, %s1556_s11 }
  0x20   : > { %p1565_p4 = scmp.lt.u32.totalorder %s1556_s11, %s1865_s14 }
  0x21   : > { %p1559_p11 = pnand %p1558_p10, %p1557_p9  ;;  %p1564_p2 = por %p1563_p0, %p1562_p13 }
  0x23   : > { %p1560_p12 = pneg %p1559_p11  ;;  %p1566_p5 = por %p1565_p4, %p1564_p2 }
  0x25   : > { %p1567_p1 = pnand %p1566_p5, %p1560_p12 }
  0x27   : > { %1570 = shalt.err (!%p1567_p1)
}
  0x28   : > { %s1571_s9 = scalar_lea.vmem %s1867_s16, 1024  ;;  %s1744_s10 = smov [#allocation2]  }
  0x29   : > { %p1572_p9 = scmp.ne.s32.totalorder %s1867_s16, %s1571_s9  ;;  %s1576_s12 = sshll.u32 %s1744_s10, 4  ;;  %s1577_s12 = int_to_ptr.vmem [resolvable:$false] %s1576_s12 }
  0x2a   : > { %s1578_s6 = scalar_lea.vmem %s1577_s12, 2048  ;;  %p1579_p6 = scmp.lt.s32.totalorder %s1867_s16, %s1577_s12 }
  0x2b   : > { %p1574_p11 = pnand %p1572_p9, %p1558_p10  ;;  %p1580_p13 = scmp.lt.s32.totalorder %s1578_s6, %s1571_s9 }
  0x2d   : > { %p1575_p8 = pneg %p1574_p11  ;;  %p1581_p0 = por %p1580_p13, %p1579_p6 }
  0x2f   : > { %p1582_p2 = pnand %p1581_p0, %p1575_p8 }
  0x31   : > { %1585 = shalt.err (!%p1582_p2)
}
  0x32   : > { %s2448_s11 = smov 256   ;;  %s1746_s13 = smov 16  }
  0x33   : > { %1346 = dma.hbm_to_vmem [thread:$0]  (!%p1871_p7), %s1865_s14, 1024, %s1867_s16, %s1876_s21, %s2448_s11, %s2448_s11, %s1746_s13  }
  0x34   : > { %p249_p1 = scmp.lt.s32.totalorder %s1742_s28, 5  ;;  %p2470_p5 = scmp.ge.s32.totalorder %s1742_s28, 1 }
  0x35   : > { %s1246_s9 = sadd.s32 4294967294, %s1742_s28   ;;  %s33_s10 = sadd.s32 1, %s1734_s26 }
  0x36   : > { %p1909_p6 = pnand %p2470_p5, %p249_p1  ;;  %p34_p8 = scmp.ge.s32.totalorder %s33_s10, 2 }
  0x37   : > { %s71_s12 = sadd.s32 1, %s1710_s20  ;;  %p78_p10 = scmp.ne.s32.totalorder %s1710_s20, %s1706_s19 }
  0x38   : > { %p84_p12 = scmp.ne.s32.totalorder %s1706_s19, %s1702_s18  ;;  %s2509_s10 = smov (%p34_p8, %s33_s10), 0 }
  0x39   : > { %2472 = sst [smem:[#allocation14_spill]] %s2509_s10  ;;  %s2511_s30 = smov (!%p34_p8, %s36_s30), %s1738_s27 }
  0x3a   : > { %s67_s14 = ssub.s32 %s1734_s26, %s2509_s10  ;;  %p2473_p7 = scmp.eq.s32.totalorder %s1742_s28, 0 }
  0x3b   : > { %p38_p9 = scmp.ge.s32.totalorder %s2511_s30, 2  ;;  %p1935_p11 = por %p84_p12, %p1847_p3 }
  0x3c   : > { %p1929_p4 = por %p78_p10, %p2473_p7  ;;  %p173_p13 = scmp.eq.s32.totalorder %s1245_s29, 3 }
  0x3d   : > { %s2475_s17 = scalar_select %p1935_p11, 1, 0 }
  0x3e   : > { %p179_p0 = scmp.eq.s32.totalorder %s1246_s9, 3  ;;  %s2513_s30 = smov (%p38_p9, %s2511_s30), 0 }
  0x3f   : > { %p1943_p2 = por %p173_p13, %p78_p10  ;;  %s40_s7 = ssub.s32 %s1738_s27, %s2513_s30 }
  0x40   : > { %p1947_p1 = por %p179_p0, %p84_p12  ;;  %s229_s13 = sand.u32 1, %s1710_s20  }
  0x41   : > { %s2476_s21 = scalar_select %p1943_p2, 1, 0 }
  0x42   : > { %s2478_s6 = scalar_select %p1947_p1, 1, 0 }
  0x43   : > { %2477 = sst [smem:[#allocation15_spill]] %s2476_s21  ;;  %p41_p3 = scmp.eq.s32.totalorder %s40_s7, 0 }
  0x44   : > { %2479 = sst [smem:[#allocation16_spill]] %s2478_s6  ;;  %s68_s11 = sor.u32 %s67_s14, %s40_s7 }
  0x45   : > { %p69_p5 = scmp.eq.s32.totalorder %s68_s11, 0  ;;  %s2480_s29 = sadd.s32 1, %s1722_s23 }
  0x46   : > { %s1957_s9 = scalar_select %p41_p3, %s1722_s23, %s2480_s29  }
  0x47   : > { %s1960_s0 = scalar_select %p69_p5, %s1710_s20, %s71_s12  }
  0x48   : > { %s1252_s10 = sshll.u32 %s229_s13, 5  ;;  %s1253_s18 = sshll.u32 %s1738_s27, 3 }
  0x49   : > { %s238_s5 = sadd.s32 %s1734_s26, %s1253_s18  ;;  %s233_s24 = scalar_lea.vmem [#allocation5], %s1252_s10 }
  0x4a   : > { %s1254_s21 = sshll.u32 %s238_s5, 7  ;;  %s241_s25 = sshll.u32 %s233_s24, 4  ;;  %s1969_s25 = int_to_ptr.vmem [resolvable:$true] %s241_s25 }
  0x4b   : > { %s1967_s2 = scalar_lea.hbm %s2440_s1, %s1254_s21  ;;  %p2481_p8 = scmp.lt.s32.totalorder %s1742_s28, 4 }
  0x4c   : > { %s1979_s5 = scalar_lea.sflag [#allocation6], %s229_s13  ;;  %s1586_s18 = scalar_lea.hbm %s1967_s2, 512 }
  0x4d   : > { %p1975_p10 = pnand %p2481_p8, %p1929_p4  ;;  %p1587_p12 = scmp.ne.s32.totalorder %s1967_s2, %s1586_s18 }
  0x4e   : > { %s1591_s10 = scalar_lea.hbm %s2440_s1, 2048  ;;  %p1592_p4 = scmp.lt.u32.totalorder %s1967_s2, %s2440_s1 }
  0x4f   : > { %p1588_p7 = pneg %p1975_p10  ;;  %p1593_p0 = scmp.lt.u32.totalorder %s1591_s10, %s1586_s18 }
  0x50   : > { %p1595_p5 = scmp.lt.u32.totalorder %s1586_s18, %s1967_s2 }
  0x51   : > { %p1589_p9 = pnand %p1588_p7, %p1587_p12  ;;  %p1594_p3 = por %p1593_p0, %p1592_p4 }
  0x53   : > { %p1590_p13 = pneg %p1589_p9  ;;  %p1596_p8 = por %p1595_p5, %p1594_p3 }
  0x55   : > { %p1597_p1 = pnand %p1596_p8, %p1590_p13 }
  0x57   : > { %1600 = shalt.err (!%p1597_p1)
}
  0x58   : > { %s1601_s16 = scalar_lea.vmem %s1969_s25, 512  ;;  %s1747_s21 = smov [#allocation5]  }
  0x59   : > { %p1602_p12 = scmp.ne.s32.totalorder %s1969_s25, %s1601_s16  ;;  %s1606_s6 = sshll.u32 %s1747_s21, 4  ;;  %s1607_s6 = int_to_ptr.vmem [resolvable:$false] %s1606_s6 }
  0x5a   : > { %s1608_s7 = scalar_lea.vmem %s1607_s6, 1024  ;;  %p1609_p11 = scmp.lt.s32.totalorder %s1969_s25, %s1607_s6 }
  0x5b   : > { %p1604_p9 = pnand %p1602_p12, %p1588_p7  ;;  %p1610_p4 = scmp.lt.s32.totalorder %s1608_s7, %s1601_s16 }
  0x5d   : > { %p1605_p2 = pneg %p1604_p9  ;;  %p1611_p0 = por %p1610_p4, %p1609_p11 }
  0x5f   : > { %p1612_p3 = pnand %p1611_p0, %p1605_p2 }
  0x61   : > { %1615 = shalt.err (!%p1612_p3)
}
  0x62   : > { %s1748_s13 = smov 128   ;;  %s1749_s29 = smov 8  }
  0x63   : > { %s2483_s18 = smov 256   ;;  %253 = sbr.rel (%p1909_p6) target bundleno = 1497 (0x5d9), region = 40 }
  0x64   : > { %1349 = dma.hbm_to_vmem [thread:$0]  (!%p1975_p10), %s1967_s2, 512, %s1969_s25, %s1979_s5, %s2483_s18, %s1748_s13, %s1749_s29  }
  0x65   : > { %s255_s4 = sand.u32 (!%p1909_p6), 1, %s1718_s22   ;;  %p2484_p11 = scmp.ne.s32.totalorder (!%p1909_p6), %s2467_s8, 0 }
  0x66   : > { %s1256_s24 = sshll.u32 (!%p1909_p6), %s255_s4, 6  ;;  %s256_s10 = scalar_lea.sflag (!%p1909_p6), [#allocation3], %s255_s4 }
  0x67   : > { %s259_s12 = scalar_lea.vmem (!%p1909_p6), [#allocation2], %s1256_s24 }
  0x6a   : > { %1689 = dma.done.wait (%p2484_p11), %s256_s10, 1024  }
  0x6b   : > { %1691 = vsyncadd (%p2484_p11), %s256_s10, 4294966272  ;;  %s2016_s14 = sand.u32 1, %s1706_s19   ;;  %p2485_p6 = scmp.ne.s32.totalorder %s2475_s17, 0 }
  0x6c   : > { %s1257_s2 = sshll.u32 %s2016_s14, 5  ;;  %s265_s25 = scalar_lea.sflag [#allocation6], %s2016_s14 }
  0x6d   : > { %s268_s15 = scalar_lea.vmem [#allocation5], %s1257_s2 }
  0x6e   : > { %1693 = dma.done.wait (%p2485_p6), %s265_s25, 512  }
  0x6f   : > { %1695 = vsyncadd (%p2485_p6), %s265_s25, 4294966784  ;;  %v1750_v0 = vmov 0   ;;  %v313_v1 = vld [vmem:[%s268_s15] sm:$0xff]  ;;  %v314_v2 = vld [vmem:[%s268_s15 + $0x8] sm:$0xff]  ;;  %s2486_s16 = sld [smem:[#allocation18_spill]]  ;;  %vm347_vm0 = vcmask 261120  }
  0x70   : > { %392 = vmatprep.mubr.bf16.mxu0 %v1750_v0  ;;  %v315_v3 = vld [vmem:[%s268_s15 + $0x10] sm:$0xff]  ;;  %v317_v4 = vpack.c.bf16 %v314_v2, %v313_v1  ;;  %v316_v5 = vld [vmem:[%s268_s15 + $0x18] sm:$0xff]  ;;  %v302_v6 = vld [vmem:[%s259_s12 + $0x8] sm:$0xff]  ;;  %s2487_s25 = sld [smem:[#allocation19_spill]]  ;;  %s2489_s8 = sld [smem:[#allocation13_spill]] }
  0x71   : > { %v304_v7 = vld [vmem:[%s259_s12 + $0x18] sm:$0xff]  ;;  %v301_v9 = vld [vmem:[%s259_s12] sm:$0xff]  ;;  %v303_v10 = vld [vmem:[%s259_s12 + $0x10] sm:$0xff]  ;;  %v318_v12 = vpack.c.bf16 %v316_v5, %v315_v3  ;;  %s2490_s17 = sld [smem:[#allocation12_spill]]  ;;  %s299_s7 = scalar_lea.vmem [#allocation7], %s1257_s2 }
  0x72   : > { %v310_v8 = vpack.c.bf16 %v304_v7, %v302_v6  ;;  %v306_v11 = vld [vmem:[%s259_s12 + $0x28] sm:$0xff]  ;;  %445 = vxpose.xlu0.c.b16.start [1/2] (short) %v317_v4, 128  ;;  %v309_v13 = vpack.c.bf16 %v303_v10, %v301_v9  ;;  %v308_v14 = vld [vmem:[%s259_s12 + $0x38] sm:$0xff]  ;;  %v305_v15 = vld [vmem:[%s259_s12 + $0x20] sm:$0xff]  ;;  %s2491_s13 = sld [smem:[#allocation15_spill]]  ;;  %s1134_s29 = sshll.u32 %s299_s7, 4  ;;  %s2371_s29 = int_to_ptr.vmem [resolvable:$true] %s1134_s29 }
  0x73   : > { %v307_v16 = vld [vmem:[%s259_s12 + $0x30] sm:$0xff]  ;;  %v312_v17 = vpack.c.bf16 %v308_v14, %v306_v11  ;;  %v1452_v19 = vld [vmem:[%s2442_s3] sm:$0xff]   ;;  %v1453_v22 = vld [vmem:[%s2442_s3 + $0x8] sm:$0xff]   ;;  %s2492_s10 = sld [smem:[#allocation20_spill]]  ;;  %s1120_s2 = scalar_lea.sflag [#allocation4], %s2016_s14 }
  0x74   : > { %360 = vmatprep.subr.bf16.mxu0 %v310_v8  ;;  %v311_v18 = vpack.c.bf16 %v307_v16, %v305_v15  ;;  %v1456_v24 = vld [vmem:[%s2442_s3 + $0x10] sm:$0xff]   ;;  %v1457_v27 = vld [vmem:[%s2442_s3 + $0x18] sm:$0xff]  }
  0x75   : > { %361 = vmatpush1.bf16.msra.mxu0 %v309_v13  ;;  %v1454_v20 = vld [vmem:[%s2486_s16] sm:$0xff]   ;;  %v1455_v21 = vld [vmem:[%s2486_s16 + $0x8] sm:$0xff]  }
  0x76   : > { %362 = vmatprep.subr.bf16.mxu0 %v312_v17  ;;  %446 = vxpose.xlu0.c.b16.end [2/2] (short) %v318_v12, 128  ;;  %s2488_s15 = smov %s2487_s25  ;;  %s1290_s21 = sshll.u32 %s2489_s8, 3 }
  0x77   : > { %1309 = vmatprep.subr.bf16.mxu1 %v1454_v20  ;;  %s1131_s6 = sadd.s32 %s2490_s17, %s1290_s21  ;;  %s1751_s8 = smov [#allocation7]  }
  0x78   : > { %1310 = vmatpush3.bf16.msra.mxu1 %v1454_v20  ;;  %s1291_s18 = sshll.u32 %s1131_s6, 7  ;;  %p2493_p1 = scmp.ne.s32.totalorder %s2491_s13, 0 }
  0x79   : > { %363 = vmatpush1.bf16.msra.mxu0 %v311_v18  ;;  %1311 = vmatprep.subr.bf16.mxu1 %v1455_v21  ;;  %s2376_s12 = scalar_lea.hbm %s2492_s10, %s1291_s18  ;;  %s1620_s17 = sshll.u32 %s1751_s8, 4  ;;  %s1621_s17 = int_to_ptr.vmem [resolvable:$false] %s1620_s17 }
  0x7a   : > { %s1622_s11 = scalar_lea.vmem %s1621_s17, 1024  ;;  %p1623_p13 = scmp.lt.s32.totalorder %s2371_s29, %s1621_s17 }
  0x7c   : > { %1263 = vmatmul.mubr.msk.bf16.vlgmr.msra.gmra.mrb[0].mxu0 %vm347_vm0, %v1452_v19  ;;  %1312 = vmatpush3.bf16.msra.mxu1 %v1455_v21 }
  0x7d   : > { %402 = vmatprep.mubr.bf16.mxu0 %v1750_v0 }
  0x84   : > { %1264 = vmatmul.mubr.msk.bf16.gmra.mrb[4].mxu0 %vm347_vm0, %v1453_v22 }
  0x85   : > { %412 = vmatprep.mubr.bf16.mxu0 %v1750_v0 }
  0x8c   : > { %1265 = vmatmul.mubr.msk.bf16.gmra.mrb[8].mxu0 %vm347_vm0, %v1456_v24 }
  0x8d   : > { %422 = vmatprep.mubr.bf16.mxu0 %v1750_v0 }
  0x94   : > { %1266 = vmatmul.mubr.msk.bf16.gmra.mrb[12].mxu0 %vm347_vm0, %v1457_v27 }
  0x95   : > { %658 = vmatprep.mubr.bf16.mxu0 %v1750_v0 }
  0xd8   : > { %v453_v23 = vpop.trf.xlu0 }
  0xd9   : > { %1313 = vmatprep.mubr.msk.bf16.mxu1 %vm347_vm0, %v453_v23 }
  0xdc   : > { %v454_v25 = vpop.trf.xlu0 }
  0xdd   : > { %1314 = vmatmul.mubr.msk.bf16.vlgmr.msra.gmra.mrb[0].mxu1 %vm347_vm0, %v454_v25 }
  0xe0   : > { %v455_v26 = vpop.trf.xlu0 }
  0xe1   : > { %1317 = vmatprep.mubr.msk.bf16.mxu1 %vm347_vm0, %v455_v26 }
  0xe4   : > { %v456_v28 = vpop.trf.xlu0 }
  0xe5   : > { %1318 = vmatmul.mubr.msk.bf16.gmra.mrb[4].mxu1 %vm347_vm0, %v456_v28 }
  0xe8   : > { %v457_v29 = vpop.trf.xlu0 }
  0xe9   : > { %1321 = vmatprep.mubr.msk.bf16.mxu1 %vm347_vm0, %v457_v29 }
  0xec   : > { %v458_v30 = vpop.trf.xlu0 }
  0xed   : > { %1322 = vmatmul.mubr.msk.bf16.gmra.mrb[8].mxu1 %vm347_vm0, %v458_v30 }
  0xf0   : > { %v459_v31 = vpop.trf.xlu0 }
  0xf1   : > { %1325 = vmatprep.mubr.msk.bf16.mxu1 %vm347_vm0, %v459_v31 }
  0xf4   : > { %v460_v32 = vpop.trf.xlu0 }
  0xf5   : > { %1326 = vmatmul.mubr.msk.bf16.gmra.mrb[12].mxu1 %vm347_vm0, %v460_v32 }
 0x14f   : > { %v394_v33 = vpop.f32.mrb[0].mxu0 }
 0x150   : > { %v396_v34 = vpop.f32.mrb[1].mxu0 }
 0x151   : > { %v398_v35 = vpop.f32.mrb[2].mxu0 }
 0x152   : > { %v433_v36 = vpack.c.bf16 %v398_v35, %v394_v33  ;;  %v400_v37 = vpop.f32.mrb[3].mxu0 }
 0x153   : > { %v434_v38 = vpack.c.bf16 %v400_v37, %v396_v34 }
 0x155   : > { %626 = vmatprep.subr.bf16.mxu0 %v434_v38 }
 0x156   : > { %627 = vmatpush1.bf16.msra.mxu0 %v433_v36 }
 0x157   : > { %v404_v39 = vpop.f32.mrb[4].mxu0 }
 0x158   : > { %v406_v40 = vpop.f32.mrb[5].mxu0 }
 0x159   : > { %v408_v41 = vpop.f32.mrb[6].mxu0 }
 0x15a   : > { %v435_v42 = vpack.c.bf16 %v408_v41, %v404_v39  ;;  %v410_v43 = vpop.f32.mrb[7].mxu0 }
 0x15b   : > { %v436_v44 = vpack.c.bf16 %v410_v43, %v406_v40 }
 0x15d   : > { %628 = vmatprep.subr.bf16.mxu0 %v436_v44 }
 0x15e   : > { %629 = vmatpush1.bf16.msra.mxu0 %v435_v42 }
 0x15f   : > { %v2061_v45 = vpop.f32.mrb[8].mxu0 }
 0x160   : > { %v416_v47 = vpop.f32.mrb[9].mxu0 }
 0x161   : > { %v2063_v49 = vpop.f32.mrb[10].mxu0 }
 0x162   : > { %v437_v51 = vpack.c.bf16 %v2063_v49, %v2061_v45  ;;  %v420_v52 = vpop.f32.mrb[11].mxu0 }
 0x163   : > { %v438_v55 = vpack.c.bf16 %v420_v52, %v416_v47 }
 0x165   : > { %1027 = vmatprep.mubr.bf16.mxu1 %v438_v55 }
 0x167   : > { %v2069_v57 = vpop.f32.mrb[12].mxu0 }
 0x168   : > { %v2071_v59 = vpop.f32.mrb[13].mxu0 }
 0x169   : > { %v2073_v61 = vpop.f32.mrb[14].mxu0 }
 0x16a   : > { %v439_v63 = vpack.c.bf16 %v2073_v61, %v2069_v57  ;;  %v2077_v1 = vpop.f32.mrb[15].mxu0 }
 0x16b   : > { %v440_v4 = vpack.c.bf16 %v2077_v1, %v2071_v59 }
 0x1b0   : > { %v1315_v46 = vpop.f32.mrb[0].mxu1 }
 0x1b1   : > { %v531_v48 = vpop.f32.mrb[1].mxu1 }
 0x1b2   : > { %v1316_v50 = vpop.f32.mrb[2].mxu1 }
 0x1b3   : > { %v595_v53 = vpack.c.bf16 %v1316_v50, %v1315_v46  ;;  %v534_v54 = vpop.f32.mrb[3].mxu1 }
 0x1b4   : > { %v594_v56 = vpack.c.bf16 %v534_v54, %v531_v48 }
 0x1b6   : > { %1277 = vmatmul.mubr.msk.bf16.vlgmr.msra.gmra.mrb[16].mxu0 %vm347_vm0, %v594_v56 }
 0x1b7   : > { %668 = vmatprep.mubr.bf16.mxu0 %v1750_v0 }
 0x1b8   : > { %v1319_v58 = vpop.f32.mrb[4].mxu1 }
 0x1b9   : > { %v547_v60 = vpop.f32.mrb[5].mxu1 }
 0x1ba   : > { %v1320_v62 = vpop.f32.mrb[6].mxu1 }
 0x1bb   : > { %v597_v2 = vpack.c.bf16 %v1320_v62, %v1319_v58  ;;  %v550_v3 = vpop.f32.mrb[7].mxu1 }
 0x1bc   : > { %v596_v5 = vpack.c.bf16 %v550_v3, %v547_v60 }
 0x1be   : > { %1278 = vmatmul.mubr.msk.bf16.gmra.mrb[20].mxu0 %vm347_vm0, %v595_v53 }
 0x1bf   : > { %678 = vmatprep.mubr.bf16.mxu0 %v1750_v0 }
 0x1c0   : > { %v1323_v6 = vpop.f32.mrb[8].mxu1 }
 0x1c1   : > { %v563_v7 = vpop.f32.mrb[9].mxu1 }
 0x1c2   : > { %v1324_v8 = vpop.f32.mrb[10].mxu1 }
 0x1c3   : > { %v599_v9 = vpack.c.bf16 %v1324_v8, %v1323_v6  ;;  %v566_v10 = vpop.f32.mrb[11].mxu1 }
 0x1c4   : > { %v598_v11 = vpack.c.bf16 %v566_v10, %v563_v7 }
 0x1c6   : > { %1279 = vmatmul.mubr.msk.bf16.gmra.mrb[24].mxu0 %vm347_vm0, %v596_v5 }
 0x1c7   : > { %688 = vmatprep.mubr.bf16.mxu0 %v1750_v0 }
 0x1c8   : > { %v1327_v12 = vpop.f32.mrb[12].mxu1 }
 0x1c9   : > { %v579_v13 = vpop.f32.mrb[13].mxu1 }
 0x1ca   : > { %v1328_v14 = vpop.f32.mrb[14].mxu1 }
 0x1cb   : > { %v601_v15 = vpack.c.bf16 %v1328_v14, %v1327_v12  ;;  %v582_v16 = vpop.f32.mrb[15].mxu1 }
 0x1cc   : > { %v600_v17 = vpack.c.bf16 %v582_v16, %v579_v13 }
 0x1ce   : > { %1280 = vmatmul.mubr.msk.bf16.gmra.mrb[28].mxu0 %vm347_vm0, %v597_v2 }
 0x1cf   : > { %698 = vmatprep.mubr.bf16.mxu0 %v1750_v0 }
 0x1d6   : > { %1281 = vmatmul.mubr.msk.bf16.gmra.mrb[32].mxu0 %vm347_vm0, %v598_v11 }
 0x1d7   : > { %708 = vmatprep.mubr.bf16.mxu0 %v1750_v0 }
 0x1de   : > { %1282 = vmatmul.mubr.msk.bf16.gmra.mrb[36].mxu0 %vm347_vm0, %v599_v9 }
 0x1df   : > { %718 = vmatprep.mubr.bf16.mxu0 %v1750_v0 }
 0x1e6   : > { %1283 = vmatmul.mubr.msk.bf16.gmra.mrb[40].mxu0 %vm347_vm0, %v600_v17 }
 0x1e7   : > { %728 = vmatprep.mubr.bf16.mxu0 %v1750_v0 }
 0x1ee   : > { %1284 = vmatmul.mubr.msk.bf16.gmra.mrb[44].mxu0 %vm347_vm0, %v601_v15 }
 0x289   : > { %v2094_v18 = vpop.f32.mrb[16].mxu0 }
 0x28a   : > { %v2096_v19 = vpop.f32.mrb[17].mxu0 }
 0x28b   : > { %v2098_v20 = vpop.f32.mrb[18].mxu0  ;;  %v739_v21 = vmax.f32 %v2094_v18, %v2096_v19 }
 0x28c   : > { %v2102_v22 = vpop.f32.mrb[19].mxu0 }
 0x28d   : > { %740 = vmax.xlane.f32.xlu1 %v739_v21  ;;  %v742_v23 = vmax.f32 %v2098_v20, %v2102_v22 }
 0x291   : > { %743 = vmax.xlane.f32.xlu1 %v742_v23  ;;  %v2106_v24 = vpop.f32.mrb[20].mxu0 }
 0x292   : > { %v2108_v0 = vpop.f32.mrb[21].mxu0 }
 0x293   : > { %v2110_v25 = vpop.f32.mrb[22].mxu0  ;;  %v745_v26 = vmax.f32 %v2106_v24, %v2108_v0 }
 0x294   : > { %v2114_v27 = vpop.f32.mrb[23].mxu0 }
 0x295   : > { %746 = vmax.xlane.f32.xlu0 %v745_v26  ;;  %v748_v28 = vmax.f32 %v2110_v25, %v2114_v27 }
 0x297   : > { %749 = vmax.xlane.f32.xlu1 %v748_v28 }
 0x299   : > { %v2118_v29 = vpop.f32.mrb[24].mxu0 }
 0x29a   : > { %v2120_v30 = vpop.f32.mrb[25].mxu0 }
 0x29b   : > { %v2122_v31 = vpop.f32.mrb[26].mxu0  ;;  %v751_v32 = vmax.f32 %v2118_v29, %v2120_v30 }
 0x29c   : > { %v2126_v33 = vpop.f32.mrb[27].mxu0 }
 0x29d   : > { %752 = vmax.xlane.f32.xlu1 %v751_v32  ;;  %v754_v34 = vmax.f32 %v2122_v31, %v2126_v33 }
 0x2a1   : > { %755 = vmax.xlane.f32.xlu1 %v754_v34  ;;  %v2130_v35 = vpop.f32.mrb[28].mxu0 }
 0x2a2   : > { %v2132_v36 = vpop.f32.mrb[29].mxu0 }
 0x2a3   : > { %v2134_v37 = vpop.f32.mrb[30].mxu0  ;;  %v757_v38 = vmax.f32 %v2130_v35, %v2132_v36 }
 0x2a4   : > { %v2138_v39 = vpop.f32.mrb[31].mxu0 }
 0x2a5   : > { %758 = vmax.xlane.f32.xlu1 %v757_v38  ;;  %v760_v40 = vmax.f32 %v2134_v37, %v2138_v39 }
 0x2a9   : > { %761 = vmax.xlane.f32.xlu1 %v760_v40  ;;  %v2142_v41 = vpop.f32.mrb[32].mxu0 }
 0x2aa   : > { %v2144_v42 = vpop.f32.mrb[33].mxu0 }
 0x2ab   : > { %v2146_v43 = vpop.f32.mrb[34].mxu0  ;;  %v763_v44 = vmax.f32 %v2142_v41, %v2144_v42 }
 0x2ac   : > { %v2150_v46 = vpop.f32.mrb[35].mxu0 }
 0x2ad   : > { %764 = vmax.xlane.f32.xlu1 %v763_v44  ;;  %v766_v47 = vmax.f32 %v2146_v43, %v2150_v46 }
 0x2b1   : > { %767 = vmax.xlane.f32.xlu1 %v766_v47  ;;  %v2154_v48 = vpop.f32.mrb[36].mxu0 }
 0x2b2   : > { %v2156_v50 = vpop.f32.mrb[37].mxu0 }
 0x2b3   : > { %v2158_v52 = vpop.f32.mrb[38].mxu0  ;;  %v769_v53 = vmax.f32 %v2154_v48, %v2156_v50 }
 0x2b4   : > { %v2162_v54 = vpop.f32.mrb[39].mxu0 }
 0x2b5   : > { %770 = vmax.xlane.f32.xlu1 %v769_v53  ;;  %v772_v55 = vmax.f32 %v2158_v52, %v2162_v54 }
 0x2b9   : > { %773 = vmax.xlane.f32.xlu1 %v772_v55  ;;  %v2166_v56 = vpop.f32.mrb[40].mxu0 }
 0x2ba   : > { %v2168_v58 = vpop.f32.mrb[41].mxu0 }
 0x2bb   : > { %v2170_v60 = vpop.f32.mrb[42].mxu0  ;;  %v775_v62 = vmax.f32 %v2166_v56, %v2168_v58 }
 0x2bc   : > { %v2174_v2 = vpop.f32.mrb[43].mxu0 }
 0x2bd   : > { %776 = vmax.xlane.f32.xlu1 %v775_v62  ;;  %v778_v3 = vmax.f32 %v2170_v60, %v2174_v2 }
 0x2bf   : > { %779 = vmax.xlane.f32.xlu0 %v778_v3 }
 0x2c1   : > { %v2178_v5 = vpop.f32.mrb[44].mxu0 }
 0x2c2   : > { %v2180_v6 = vpop.f32.mrb[45].mxu0 }
 0x2c3   : > { %v2182_v7 = vpop.f32.mrb[46].mxu0  ;;  %v781_v8 = vmax.f32 %v2178_v5, %v2180_v6 }
 0x2c4   : > { %v2186_v9 = vpop.f32.mrb[47].mxu0 }
 0x2c5   : > { %v784_v10 = vmax.f32 %v2182_v7, %v2186_v9  ;;  %782 = vmax.xlane.f32.xlu1 %v781_v8 }
 0x2c7   : > { %785 = vmax.xlane.f32.xlu0 %v784_v10 }
 0x31a   : > { %v741_v11 = vpop.xlane.xlu1 %740 }
 0x31b   : > { %v787_v12 = vsub.f32 %v2094_v18, %v741_v11  ;;  %v788_v13 = vsub.f32 %v2096_v19, %v741_v11 }
 0x31d   : > { %v819_v14 = vmul.f32 1.442695, %v787_v12  ;;  %v821_v15 = vmul.f32 1.442695, %v788_v13 }
 0x31e   : > { %v744_v16 = vpop.xlane.xlu1 %743 }
 0x31f   : > { %1460 = vpow2.f32 %v819_v14  ;;  %v789_v17 = vsub.f32 %v2098_v20, %v744_v16  ;;  %v790_v21 = vsub.f32 %v2102_v22, %v744_v16 }
 0x320   : > { %1462 = vpow2.f32 %v821_v15 }
 0x321   : > { %v823_v23 = vmul.f32 1.442695, %v789_v17  ;;  %v825_v26 = vmul.f32 1.442695, %v790_v21 }
 0x322   : > { %v747_v28 = vpop.xlane.xlu0 %746 }
 0x323   : > { %1464 = vpow2.f32 %v823_v23  ;;  %v791_v32 = vsub.f32 %v2106_v24, %v747_v28  ;;  %v792_v34 = vsub.f32 %v2108_v0, %v747_v28 }
 0x324   : > { %1466 = vpow2.f32 %v825_v26  ;;  %v750_v18 = vpop.xlane.xlu1 %749 }
 0x325   : > { %v827_v19 = vmul.f32 1.442695, %v791_v32  ;;  %v829_v38 = vmul.f32 1.442695, %v792_v34  ;;  %v793_v40 = vsub.f32 %v2110_v25, %v750_v18  ;;  %v794_v44 = vsub.f32 %v2114_v27, %v750_v18 }
 0x327   : > { %1468 = vpow2.f32 %v827_v19  ;;  %v831_v20 = vmul.f32 1.442695, %v793_v40  ;;  %v833_v22 = vmul.f32 1.442695, %v794_v44 }
 0x328   : > { %1470 = vpow2.f32 %v829_v38 }
 0x329   : > { %v2198_v47 = vpop.eup %1460  ;;  %1472 = vpow2.f32 %v831_v20 }
 0x32a   : > { %v2200_v53 = vpop.eup %1462  ;;  %1474 = vpow2.f32 %v833_v22  ;;  %v753_v24 = vpop.xlane.xlu1 %752 }
 0x32b   : > { %v795_v0 = vsub.f32 %v2118_v29, %v753_v24  ;;  %v796_v55 = vsub.f32 %v2120_v30, %v753_v24  ;;  %v883_v25 = vadd.f32 %v2200_v53, %v2198_v47 }
 0x32d   : > { %v2206_v62 = vpop.eup %1464  ;;  %v835_v27 = vmul.f32 1.442695, %v795_v0  ;;  %v837_v3 = vmul.f32 1.442695, %v796_v55  ;;  %884 = vadd.xlane.f32.xlu1 %v883_v25 }
 0x32e   : > { %v2208_v8 = vpop.eup %1466  ;;  %v756_v10 = vpop.xlane.xlu1 %755 }
 0x32f   : > { %1476 = vpow2.f32 %v835_v27  ;;  %v797_v11 = vsub.f32 %v2122_v31, %v756_v10  ;;  %v798_v12 = vsub.f32 %v2126_v33, %v756_v10  ;;  %v886_v29 = vadd.f32 %v2208_v8, %v2206_v62 }
 0x330   : > { %1478 = vpow2.f32 %v837_v3 }
 0x331   : > { %v2214_v30 = vpop.eup %1468  ;;  %v839_v13 = vmul.f32 1.442695, %v797_v11  ;;  %v841_v14 = vmul.f32 1.442695, %v798_v12  ;;  %887 = vadd.xlane.f32.xlu0 %v886_v29 }
 0x332   : > { %v2216_v15 = vpop.eup %1470  ;;  %v759_v16 = vpop.xlane.xlu1 %758 }
 0x333   : > { %v2218_v17 = vpop.eup %1472  ;;  %1480 = vpow2.f32 %v839_v13  ;;  %v799_v21 = vsub.f32 %v2130_v35, %v759_v16  ;;  %v800_v31 = vsub.f32 %v2132_v36, %v759_v16  ;;  %v889_v33 = vadd.f32 %v2216_v15, %v2214_v30 }
 0x334   : > { %v2224_v23 = vpop.eup %1474  ;;  %1482 = vpow2.f32 %v841_v14 }
 0x335   : > { %v843_v26 = vmul.f32 1.442695, %v799_v21  ;;  %v845_v28 = vmul.f32 1.442695, %v800_v31  ;;  %890 = vadd.xlane.f32.xlu1 %v889_v33  ;;  %v892_v32 = vadd.f32 %v2224_v23, %v2218_v17 }
 0x336   : > { %v762_v34 = vpop.xlane.xlu1 %761 }
 0x337   : > { %1484 = vpow2.f32 %v843_v26  ;;  %v801_v18 = vsub.f32 %v2134_v37, %v762_v34  ;;  %v802_v35 = vsub.f32 %v2138_v39, %v762_v34  ;;  %893 = vadd.xlane.f32.xlu0 %v892_v32 }
 0x338   : > { %1486 = vpow2.f32 %v845_v28 }
 0x339   : > { %v2230_v36 = vpop.eup %1476  ;;  %v847_v19 = vmul.f32 1.442695, %v801_v18  ;;  %v849_v38 = vmul.f32 1.442695, %v802_v35 }
 0x33a   : > { %v2232_v40 = vpop.eup %1478  ;;  %v765_v44 = vpop.xlane.xlu1 %764 }
 0x33b   : > { %1488 = vpow2.f32 %v847_v19  ;;  %v803_v20 = vsub.f32 %v2142_v41, %v765_v44  ;;  %v804_v22 = vsub.f32 %v2144_v42, %v765_v44  ;;  %v895_v24 = vadd.f32 %v2232_v40, %v2230_v36 }
 0x33c   : > { %1490 = vpow2.f32 %v849_v38 }
 0x33d   : > { %v2238_v37 = vpop.eup %1480  ;;  %v851_v39 = vmul.f32 1.442695, %v803_v20  ;;  %v853_v0 = vmul.f32 1.442695, %v804_v22  ;;  %896 = vadd.xlane.f32.xlu1 %v895_v24 }
 0x33e   : > { %v2240_v55 = vpop.eup %1482  ;;  %v768_v25 = vpop.xlane.xlu1 %767 }
 0x33f   : > { %1492 = vpow2.f32 %v851_v39  ;;  %v805_v27 = vsub.f32 %v2146_v43, %v768_v25  ;;  %v806_v3 = vsub.f32 %v2150_v46, %v768_v25  ;;  %v898_v41 = vadd.f32 %v2240_v55, %v2238_v37 }
 0x340   : > { %1494 = vpow2.f32 %v853_v0 }
 0x341   : > { %v2246_v42 = vpop.eup %1484  ;;  %v855_v10 = vmul.f32 1.442695, %v805_v27  ;;  %v857_v11 = vmul.f32 1.442695, %v806_v3  ;;  %899 = vadd.xlane.f32.xlu0 %v898_v41 }
 0x342   : > { %v2248_v12 = vpop.eup %1486  ;;  %v771_v29 = vpop.xlane.xlu1 %770 }
 0x343   : > { %1496 = vpow2.f32 %v855_v10  ;;  %v807_v13 = vsub.f32 %v2154_v48, %v771_v29  ;;  %v808_v14 = vsub.f32 %v2156_v50, %v771_v29  ;;  %v901_v43 = vadd.f32 %v2248_v12, %v2246_v42 }
 0x344   : > { %1498 = vpow2.f32 %v857_v11 }
 0x345   : > { %v2254_v46 = vpop.eup %1488  ;;  %v859_v16 = vmul.f32 1.442695, %v807_v13  ;;  %v861_v21 = vmul.f32 1.442695, %v808_v14  ;;  %902 = vadd.xlane.f32.xlu1 %v901_v43 }
 0x346   : > { %v2256_v31 = vpop.eup %1490  ;;  %v774_v33 = vpop.xlane.xlu1 %773 }
 0x347   : > { %1500 = vpow2.f32 %v859_v16  ;;  %v809_v26 = vsub.f32 %v2158_v52, %v774_v33  ;;  %v810_v28 = vsub.f32 %v2162_v54, %v774_v33  ;;  %v904_v48 = vadd.f32 %v2256_v31, %v2254_v46 }
 0x348   : > { %1502 = vpow2.f32 %v861_v21 }
 0x349   : > { %v2262_v50 = vpop.eup %1492  ;;  %v863_v32 = vmul.f32 1.442695, %v809_v26  ;;  %v865_v34 = vmul.f32 1.442695, %v810_v28  ;;  %905 = vadd.xlane.f32.xlu0 %v904_v48 }
 0x34a   : > { %v2264_v18 = vpop.eup %1494  ;;  %v777_v35 = vpop.xlane.xlu1 %776 }
 0x34b   : > { %1504 = vpow2.f32 %v863_v32  ;;  %v811_v19 = vsub.f32 %v2166_v56, %v777_v35  ;;  %v812_v38 = vsub.f32 %v2168_v58, %v777_v35  ;;  %v907_v52 = vadd.f32 %v2264_v18, %v2262_v50 }
 0x34c   : > { %1506 = vpow2.f32 %v865_v34  ;;  %v780_v54 = vpop.xlane.xlu0 %779 }
 0x34d   : > { %v2270_v44 = vpop.eup %1496  ;;  %v867_v20 = vmul.f32 1.442695, %v811_v19  ;;  %v869_v22 = vmul.f32 1.442695, %v812_v38  ;;  %v813_v24 = vsub.f32 %v2170_v60, %v780_v54  ;;  %v814_v39 = vsub.f32 %v2174_v2, %v780_v54  ;;  %908 = vadd.xlane.f32.xlu1 %v907_v52 }
 0x34e   : > { %v2274_v0 = vpop.eup %1498 }
 0x34f   : > { %1508 = vpow2.f32 %v867_v20  ;;  %v871_v56 = vmul.f32 1.442695, %v813_v24  ;;  %v873_v25 = vmul.f32 1.442695, %v814_v39  ;;  %v910_v58 = vadd.f32 %v2274_v0, %v2270_v44 }
 0x350   : > { %1510 = vpow2.f32 %v869_v22 }
 0x351   : > { %v2278_v27 = vpop.eup %1500  ;;  %1512 = vpow2.f32 %v871_v56  ;;  %911 = vadd.xlane.f32.xlu0 %v910_v58 }
 0x352   : > { %v2280_v3 = vpop.eup %1502  ;;  %1514 = vpow2.f32 %v873_v25  ;;  %v783_v60 = vpop.xlane.xlu1 %782 }
 0x353   : > { %v815_v2 = vsub.f32 %v2178_v5, %v783_v60  ;;  %v816_v41 = vsub.f32 %v2180_v6, %v783_v60  ;;  %v913_v10 = vadd.f32 %v2280_v3, %v2278_v27 }
 0x354   : > { %v786_v11 = vpop.xlane.xlu0 %785 }
 0x355   : > { %v2286_v29 = vpop.eup %1504  ;;  %v875_v13 = vmul.f32 1.442695, %v815_v2  ;;  %v877_v14 = vmul.f32 1.442695, %v816_v41  ;;  %914 = vadd.xlane.f32.xlu1 %v913_v10  ;;  %v817_v43 = vsub.f32 %v2182_v7, %v786_v11  ;;  %v818_v16 = vsub.f32 %v2186_v9, %v786_v11 }
 0x356   : > { %v2290_v21 = vpop.eup %1506 }
 0x357   : > { %1516 = vpow2.f32 %v875_v13  ;;  %v879_v33 = vmul.f32 1.442695, %v817_v43  ;;  %v881_v5 = vmul.f32 1.442695, %v818_v16  ;;  %v916_v6 = vadd.f32 %v2290_v21, %v2286_v29 }
 0x358   : > { %1518 = vpow2.f32 %v877_v14 }
 0x359   : > { %v2294_v26 = vpop.eup %1508  ;;  %1520 = vpow2.f32 %v879_v33  ;;  %917 = vadd.xlane.f32.xlu0 %v916_v6 }
 0x35a   : > { %v2296_v28 = vpop.eup %1510  ;;  %1522 = vpow2.f32 %v881_v5 }
 0x35b   : > { %v2298_v48 = vpop.eup %1512  ;;  %v919_v7 = vadd.f32 %v2296_v28, %v2294_v26 }
 0x35c   : > { %v2302_v9 = vpop.eup %1514 }
 0x35d   : > { %920 = vadd.xlane.f32.xlu1 %v919_v7  ;;  %v922_v32 = vadd.f32 %v2302_v9, %v2298_v48 }
 0x35f   : > { %923 = vadd.xlane.f32.xlu0 %v922_v32 }
 0x361   : > { %v2306_v34 = vpop.eup %1516 }
 0x362   : > { %v2308_v35 = vpop.eup %1518 }
 0x363   : > { %v2310_v19 = vpop.eup %1520  ;;  %v925_v38 = vadd.f32 %v2308_v35, %v2306_v34 }
 0x364   : > { %v2314_v52 = vpop.eup %1522 }
 0x365   : > { %926 = vadd.xlane.f32.xlu1 %v925_v38  ;;  %v928_v54 = vadd.f32 %v2314_v52, %v2310_v19 }
 0x367   : > { %929 = vadd.xlane.f32.xlu0 %v928_v54 }
 0x3ba   : > { %v885_v20 = vpop.xlane.xlu1 %884 }
 0x3bb   : > { %1524 = vrcp.f32 %v885_v20 }
 0x3be   : > { %v888_v22 = vpop.xlane.xlu0 %887 }
 0x3bf   : > { %1526 = vrcp.f32 %v888_v22 }
 0x3c2   : > { %v891_v24 = vpop.xlane.xlu1 %890 }
 0x3c3   : > { %1528 = vrcp.f32 %v891_v24 }
 0x3c4   : > { %v894_v39 = vpop.xlane.xlu0 %893 }
 0x3c5   : > { %1530 = vrcp.f32 %v894_v39  ;;  %v1525_v56 = vpop.eup %1524 }
 0x3c6   : > { %v948_v60 = vmul.f32 %v1525_v56, %v2200_v53  ;;  %v947_v41 = vmul.f32 %v1525_v56, %v2198_v47 }
 0x3c9   : > { %v1527_v25 = vpop.eup %1526 }
 0x3ca   : > { %v897_v58 = vpop.xlane.xlu1 %896  ;;  %v950_v2 = vmul.f32 %v1527_v25, %v2208_v8  ;;  %v949_v10 = vmul.f32 %v1527_v25, %v2206_v62 }
 0x3cb   : > { %1532 = vrcp.f32 %v897_v58 }
 0x3cc   : > { %v980_v11 = vpack.c.bf16 %v950_v2, %v948_v60  ;;  %v979_v13 = vpack.c.bf16 %v949_v10, %v947_v41 }
 0x3cd   : > { %v1529_v14 = vpop.eup %1528 }
 0x3ce   : > { %995 = vmatprep.subr.bf16.mxu1 %v980_v11  ;;  %v900_v43 = vpop.xlane.xlu0 %899  ;;  %v952_v33 = vmul.f32 %v1529_v14, %v2216_v15  ;;  %v951_v47 = vmul.f32 %v1529_v14, %v2214_v30 }
 0x3cf   : > { %v1531_v16 = vpop.eup %1530  ;;  %1534 = vrcp.f32 %v900_v43  ;;  %996 = vmatpush1.bf16.xpose.msra.mxu1 %v979_v13 }
 0x3d0   : > { %v954_v5 = vmul.f32 %v1531_v16, %v2224_v23  ;;  %v953_v53 = vmul.f32 %v1531_v16, %v2218_v17 }
 0x3d2   : > { %v903_v8 = vpop.xlane.xlu1 %902  ;;  %v982_v6 = vpack.c.bf16 %v954_v5, %v952_v33  ;;  %v981_v62 = vpack.c.bf16 %v953_v53, %v951_v47 }
 0x3d3   : > { %1536 = vrcp.f32 %v903_v8 }
 0x3d4   : > { %997 = vmatprep.subr.bf16.mxu1 %v982_v6 }
 0x3d5   : > { %v1533_v32 = vpop.eup %1532 }
 0x3d6   : > { %v906_v7 = vpop.xlane.xlu0 %905  ;;  %v956_v20 = vmul.f32 %v1533_v32, %v2232_v40  ;;  %v955_v23 = vmul.f32 %v1533_v32, %v2230_v36 }
 0x3d7   : > { %1538 = vrcp.f32 %v906_v7  ;;  %998 = vmatpush1.bf16.xpose.msra.mxu1 %v981_v62 }
 0x3d9   : > { %v1535_v38 = vpop.eup %1534 }
 0x3da   : > { %v909_v54 = vpop.xlane.xlu1 %908  ;;  %v958_v15 = vmul.f32 %v1535_v38, %v2240_v55  ;;  %v957_v17 = vmul.f32 %v1535_v38, %v2238_v37 }
 0x3db   : > { %1540 = vrcp.f32 %v909_v54 }
 0x3dc   : > { %v984_v22 = vpack.c.bf16 %v958_v15, %v956_v20  ;;  %v983_v24 = vpack.c.bf16 %v957_v17, %v955_v23 }
 0x3dd   : > { %v1537_v39 = vpop.eup %1536 }
 0x3de   : > { %999 = vmatprep.subr.bf16.mxu1 %v984_v22  ;;  %v912_v30 = vpop.xlane.xlu0 %911  ;;  %v960_v58 = vmul.f32 %v1537_v39, %v2248_v12  ;;  %v959_v55 = vmul.f32 %v1537_v39, %v2246_v42 }
 0x3df   : > { %1542 = vrcp.f32 %v912_v30  ;;  %1000 = vmatpush1.bf16.xpose.msra.mxu1 %v983_v24 }
 0x3e1   : > { %v1539_v56 = vpop.eup %1538 }
 0x3e2   : > { %v915_v25 = vpop.xlane.xlu1 %914  ;;  %v962_v40 = vmul.f32 %v1539_v56, %v2256_v31  ;;  %v961_v36 = vmul.f32 %v1539_v56, %v2254_v46 }
 0x3e3   : > { %1544 = vrcp.f32 %v915_v25 }
 0x3e4   : > { %v986_v60 = vpack.c.bf16 %v962_v40, %v960_v58  ;;  %v985_v37 = vpack.c.bf16 %v961_v36, %v959_v55 }
 0x3e5   : > { %v1541_v41 = vpop.eup %1540 }
 0x3e6   : > { %1001 = vmatprep.subr.bf16.mxu1 %v986_v60  ;;  %v918_v2 = vpop.xlane.xlu0 %917  ;;  %v964_v13 = vmul.f32 %v1541_v41, %v2264_v18  ;;  %v963_v31 = vmul.f32 %v1541_v41, %v2262_v50 }
 0x3e7   : > { %1546 = vrcp.f32 %v918_v2  ;;  %1002 = vmatpush1.bf16.xpose.msra.mxu1 %v985_v37 }
 0x3e9   : > { %v1543_v10 = vpop.eup %1542 }
 0x3ea   : > { %v921_v11 = vpop.xlane.xlu1 %920  ;;  %v966_v12 = vmul.f32 %v1543_v10, %v2274_v0  ;;  %v965_v42 = vmul.f32 %v1543_v10, %v2270_v44 }
 0x3eb   : > { %1548 = vrcp.f32 %v921_v11 }
 0x3ec   : > { %v924_v46 = vpop.xlane.xlu0 %923  ;;  %v988_v14 = vpack.c.bf16 %v966_v12, %v964_v13  ;;  %v987_v43 = vpack.c.bf16 %v965_v42, %v963_v31 }
 0x3ed   : > { %1550 = vrcp.f32 %v924_v46  ;;  %v1545_v16 = vpop.eup %1544 }
 0x3ee   : > { %1003 = vmatprep.subr.bf16.mxu1 %v988_v14  ;;  %v968_v53 = vmul.f32 %v1545_v16, %v2280_v3  ;;  %v967_v0 = vmul.f32 %v1545_v16, %v2278_v27 }
 0x3ef   : > { %1004 = vmatpush1.bf16.xpose.msra.mxu1 %v987_v43 }
 0x3f1   : > { %v1547_v33 = vpop.eup %1546 }
 0x3f2   : > { %v927_v5 = vpop.xlane.xlu1 %926  ;;  %v970_v18 = vmul.f32 %v1547_v33, %v2290_v21  ;;  %v969_v50 = vmul.f32 %v1547_v33, %v2286_v29 }
 0x3f3   : > { %1552 = vrcp.f32 %v927_v5 }
 0x3f4   : > { %v930_v44 = vpop.xlane.xlu0 %929  ;;  %v990_v8 = vpack.c.bf16 %v970_v18, %v968_v53  ;;  %v989_v6 = vpack.c.bf16 %v969_v50, %v967_v0 }
 0x3f5   : > { %v1549_v47 = vpop.eup %1548  ;;  %1554 = vrcp.f32 %v930_v44 }
 0x3f6   : > { %1005 = vmatprep.subr.bf16.mxu1 %v990_v8  ;;  %v972_v7 = vmul.f32 %v1549_v47, %v2296_v28  ;;  %v971_v27 = vmul.f32 %v1549_v47, %v2294_v26  ;;  %v1458_v26 = vld [vmem:[%s2487_s25] sm:$0xff]   ;;  %s1616_s25 = scalar_lea.vmem %s2371_s29, 512 }
 0x3f7   : > { %v1551_v62 = vpop.eup %1550  ;;  %1006 = vmatpush1.bf16.xpose.msra.mxu1 %v989_v6  ;;  %p1617_p2 = scmp.ne.s32.totalorder %s2371_s29, %s1616_s25  ;;  %p1624_p5 = scmp.lt.s32.totalorder %s1622_s11, %s1616_s25 }
 0x3f8   : > { %v974_v32 = vmul.f32 %v1551_v62, %v2302_v9  ;;  %v973_v3 = vmul.f32 %v1551_v62, %v2298_v48 }
 0x3f9   : > { %p1618_p10 = pnand %p1617_p2, %p2493_p1  ;;  %p1625_p8 = por %p1624_p5, %p1623_p13 }
 0x3fa   : > { %v992_v21 = vpack.c.bf16 %v974_v32, %v972_v7  ;;  %v991_v38 = vpack.c.bf16 %v973_v3, %v971_v27 }
 0x3fb   : > { %p1619_p7 = pneg %p1618_p10 }
 0x3fc   : > { %1007 = vmatprep.subr.bf16.mxu1 %v992_v21 }
 0x3fd   : > { %v1553_v29 = vpop.eup %1552  ;;  %p1626_p12 = pnand %p1625_p8, %p1619_p7 }
 0x3fe   : > { %v976_v20 = vmul.f32 %v1553_v29, %v2308_v35  ;;  %v975_v28 = vmul.f32 %v1553_v29, %v2306_v34 }
 0x3ff   : > { %v1555_v54 = vpop.eup %1554  ;;  %1008 = vmatpush1.bf16.xpose.msra.mxu1 %v991_v38 }
 0x400   : > { %v978_v15 = vmul.f32 %v1555_v54, %v2314_v52  ;;  %v977_v23 = vmul.f32 %v1555_v54, %v2310_v19 }
 0x402   : > { %v994_v17 = vpack.c.bf16 %v978_v15, %v976_v20  ;;  %v993_v9 = vpack.c.bf16 %v977_v23, %v975_v28 }
 0x404   : > { %1009 = vmatprep.subr.bf16.mxu1 %v994_v17 }
 0x407   : > { %1010 = vmatpush1.bf16.xpose.msra.mxu1 %v993_v9 }
 0x40e   : > { %1028 = vmatmul.mubr.bf16.vlgmr.msra.gmra.mrb[16].mxu1 %v437_v51 }
 0x40f   : > { %1035 = vmatprep.mubr.bf16.mxu1 %v440_v4  ;;  %v1459_v4 = vld [vmem:[%s2488_s15 + $0x8] sm:$0xff]  }
 0x416   : > { %1036 = vmatmul.mubr.bf16.gmra.mrb[20].mxu1 %v439_v63 }
 0x417   : > { %1333 = vmatprep.mubr.msk.bf16.mxu1 %vm347_vm0, %v1458_v26 }
 0x4e1   : > { %v1029_v48 = vpop.f32.mrb[16].mxu1 }
 0x4e2   : > { %v1031_v34 = vpop.f32.mrb[17].mxu1 }
 0x4e3   : > { %v1032_v45 = vpop.f32.mrb[18].mxu1 }
 0x4e4   : > { %v1048_v49 = vpack.c.bf16 %v1032_v45, %v1029_v48  ;;  %v1034_v51 = vpop.f32.mrb[19].mxu1 }
 0x4e6   : > { %1329 = vmatprep.subr.bf16.mxu1 %v1048_v49 }
 0x4e7   : > { %1330 = vmatpush3.bf16.msra.mxu1 %v1048_v49 }
 0x4e9   : > { %v1037_v59 = vpop.f32.mrb[20].mxu1 }
 0x4ea   : > { %v1039_v1 = vpop.f32.mrb[21].mxu1 }
 0x4eb   : > { %v1040_v57 = vpop.f32.mrb[22].mxu1 }
 0x4ec   : > { %v1049_v61 = vpack.c.bf16 %v1040_v57, %v1037_v59  ;;  %v1042_v63 = vpop.f32.mrb[23].mxu1 }
 0x4ee   : > { %1331 = vmatprep.subr.bf16.mxu1 %v1049_v61 }
 0x4ef   : > { %1332 = vmatpush3.bf16.msra.mxu1 %v1049_v61 }
 0x4f2   : > { %1334 = vmatmul.mubr.msk.bf16.vlgmr.msra.gmra.mrb[24].mxu1 %vm347_vm0, %v1459_v4 }
 0x5c5   : > { %v1335_v35 = vpop.f32.mrb[24].mxu1 }
 0x5c6   : > { %1117 = vst [vmem:[%s299_s7 + $0x10] sm:$0xff] %v1335_v35  ;;  %v1100_v19 = vpop.f32.mrb[25].mxu1 }
 0x5c7   : > { %1115 = vst [vmem:[%s299_s7] sm:$0xff] %v1100_v19  ;;  %v1336_v52 = vpop.f32.mrb[26].mxu1 }
 0x5c8   : > { %1118 = vst [vmem:[%s299_s7 + $0x18] sm:$0xff] %v1336_v52  ;;  %v1103_v22 = vpop.f32.mrb[27].mxu1 }
 0x5c9   : > { %1116 = vst [vmem:[%s299_s7 + $0x8] sm:$0xff] %v1103_v22 }
 0x5ca   : > { %1629 = shalt.err (!%p1626_p12)
}
 0x5cb   : > { %s1630_s5 = scalar_lea.hbm %s2376_s12, 512  ;;  %s1634_s7 = scalar_lea.hbm %s2492_s10, 2048 }
 0x5cc   : > { %p1631_p9 = scmp.ne.s32.totalorder %s2376_s12, %s1630_s5  ;;  %p1635_p3 = scmp.lt.u32.totalorder %s2376_s12, %s2492_s10 }
 0x5cd   : > { %p1636_p11 = scmp.lt.u32.totalorder %s1634_s7, %s1630_s5  ;;  %p1638_p2 = scmp.lt.u32.totalorder %s1630_s5, %s2376_s12 }
 0x5ce   : > { %p1632_p4 = pnand %p1631_p9, %p2493_p1 }
 0x5cf   : > { %p1637_p6 = por %p1636_p11, %p1635_p3 }
 0x5d0   : > { %p1633_p0 = pneg %p1632_p4 }
 0x5d1   : > { %p1639_p10 = por %p1638_p2, %p1637_p6 }
 0x5d3   : > { %p1640_p7 = pnand %p1639_p10, %p1633_p0 }
 0x5d5   : > { %1643 = shalt.err (!%p1640_p7)
}
 0x5d6   : > { %s1752_s24 = smov 128   ;;  %s1753_s25 = smov 256  }
 0x5d7   : > { %s1754_s8 = smov 8  }
 0x5d8   : > { %1341 = dma.vmem_to_hbm [thread:$0]  (%p2493_p1), %s2371_s29, 512, %s2376_s12, %s1120_s2, %s1752_s24, %s1753_s25, %s1754_s8  }
 0x5d9 PF: > { %s2494_s17 = sld [smem:[#allocation11_spill]]  ;;  %s2495_s11 = sld [smem:[#allocation16_spill]] }
 0x5da   : > { %p1355_p13 = scmp.ge.s32.totalorder %s1742_s28, 2 }
 0x5df   : > { %s1149_s21 = sand.u32 1, %s2494_s17   ;;  %p2496_p5 = scmp.ne.s32.totalorder %s2495_s11, 0 }
 0x5e0   : > { %s1150_s5 = scalar_lea.sflag [#allocation4], %s1149_s21 }
 0x5e1   : > { %p1351_p8 = pnand %p1355_p13, %p2496_p5 }
 0x5e3   : > { %1697 = dma.done.wait (!%p1351_p8), %s1150_s5, 512  }
 0x5e4   : > { %1699 = vsyncadd (!%p1351_p8), %s1150_s5, 4294966784  ;;  %s24_s28 = sadd.s32 1, %s1742_s28   ;;  %s2497_s14 = sld [smem:[#allocation14_spill]] }
 0x5e5   : > { %p21_p12 = scmp.ge.s32.totalorder %s24_s28, 6   ;;  %s2498_s18 = smov %s1706_s19 }
 0x5e6   : > { %s2499_s19 = smov %s1710_s20  ;;  %s2500_s20 = smov %s1960_s0 }
 0x5e7   : > { %s2501_s21 = smov %s1718_s22  ;;  %s2502_s22 = smov %s1722_s23 }
 0x5e8   : > { %s2503_s23 = smov %s1957_s9  ;;  %s2504_s24 = smov %s1734_s26 }
 0x5e9   : > { %s2505_s25 = smov %s1738_s27  ;;  %s2507_s27 = smov %s2513_s30 }
 0x5ea   : > { %s2506_s26 = smov %s2497_s14  ;;  %23 = sbr.rel (!%p21_p12) target bundleno = 16 (0x10), region = 98 }
 0x5f1   :  { %1155 = vsyncpa [#allocation3], 1 }
 0x5f2   :  { %1157 = vsyncpa [#allocation3 + $0x1], 1 }
 0x5f3   :  { %1158 = vsyncpa [#allocation6], 1 }
 0x5f4   :  { %1160 = vsyncpa [#allocation6 + $0x1], 1 }
 0x5f5   :  { %1161 = vsyncpa [#allocation4], 1 }
 0x5f6   :  { %1163 = vsyncpa [#allocation4 + $0x1], 1 }

</bundles_post_ra>
